<compile_context>
chip_gen: v6e
topology: v6e:2x2x1
jax: 0.10.0
libtpu: 0.0.40
codegen_flags: <defaults>
</compile_context>

<pallas_src>
import jax
import jax.numpy as jnp
from jax.experimental import pallas as pl
from jax.experimental.pallas import tpu as pltpu

_EPS = 1e-6


def _tanh_like_kernel(x_ref, r0_ref, a_ref, b_ref, o_ref):
    x = x_ref[...]        # (tb, N) float32
    r0 = r0_ref[...]      # (1, N)
    a = a_ref[...]        # (1, N)
    b = b_ref[...]        # (1, N)

    # Hoisted per-feature constants (computed on (1, N), broadcast below).
    scale_neg = a * (1.0 - r0)              # a * (1 - r0)
    scale_pos = a * (1.0 + r0)              # a * (1 + r0)
    inv_neg = 1.0 / (1.0 - r0 + _EPS)       # 1 / (1 - r0 + eps)
    inv_pos = 1.0 / (1.0 + r0 + _EPS)       # 1 / (1 + r0 + eps)

    xb = x * b                              # (tb, N)
    neg = xb <= 0.0

    # Select before the transcendental: one tanh per element instead of two.
    scale = jnp.where(neg, scale_neg, scale_pos)
    inv = jnp.where(neg, inv_neg, inv_pos)
    o_ref[...] = scale * jnp.tanh(xb * inv)


def tanh_like_forward(x, r0, a, b, *, block_rows=256):
    """x: (B, N) float32; r0/a/b: (N,) float32 per-feature parameter vectors."""
    B, N = x.shape
    tb = min(block_rows, B)
    grid = (pl.cdiv(B, tb),)

    row_spec = pl.BlockSpec((tb, N), lambda i: (i, 0))
    vec_spec = pl.BlockSpec((1, N), lambda i: (0, 0))

    return pl.pallas_call(
        _tanh_like_kernel,
        out_shape=jax.ShapeDtypeStruct((B, N), x.dtype),
        grid=grid,
        in_specs=[row_spec, vec_spec, vec_spec, vec_spec],
        out_specs=row_spec,
        compiler_params=pltpu.CompilerParams(
            dimension_semantics=("parallel",)),
    )(x,
      r0.reshape(1, N).astype(x.dtype),
      a.reshape(1, N).astype(x.dtype),
      b.reshape(1, N).astype(x.dtype))


def _tanh_like_ref(x, r0, a, b):
    """Pure-JAX reference matching the torch tanh_like exactly."""
    xb = b * x
    y1 = (1.0 - r0) * jnp.tanh(xb / (1.0 - r0 + _EPS))
    y2 = (1.0 + r0) * jnp.tanh(xb / (1.0 + r0 + _EPS))
    y = jnp.where(xb <= 0.0, y1, y2)
    return a * y


if __name__ == "__main__":
    # Small deterministic instance of TanhLike: length=128, batch=8.
    # r0/a/b emulate ValuesDict.get_values output (per-feature vectors within
    # typical bounds: r0 in (-0.5, 0.5), a and b in (0.5, 2.0)).
    B, N = 8, 128
    key = jax.random.PRNGKey(0)
    kx, kr, ka, kb = jax.random.split(key, 4)

    x = jax.random.normal(kx, (B, N), dtype=jnp.float32)
    r0 = jax.random.uniform(kr, (N,), dtype=jnp.float32, minval=-0.5, maxval=0.5)
    a = jax.random.uniform(ka, (N,), dtype=jnp.float32, minval=0.5, maxval=2.0)
    b = jax.random.uniform(kb, (N,), dtype=jnp.float32, minval=0.5, maxval=2.0)

    out = tanh_like_forward(x, r0, a, b)
    out = jax.block_until_ready(out)

    ref = _tanh_like_ref(x, r0[None, :], a[None, :], b[None, :])

    assert out.shape == (B, N)
    assert bool(jnp.all(jnp.isfinite(out)))
    assert bool(jnp.allclose(out, ref, rtol=1e-5, atol=1e-5))
    print("KERNEL_OK")
</pallas_src>

<mosaic_0001>
module attributes {stable_mosaic.version = 11 : i64} {
  func.func @_tanh_like_kernel(%arg0: i32, %arg1: memref<8x128xf32, #tpu.memory_space<vmem>>, %arg2: memref<1x128xf32, #tpu.memory_space<vmem>>, %arg3: memref<1x128xf32, #tpu.memory_space<vmem>>, %arg4: memref<1x128xf32, #tpu.memory_space<vmem>>, %arg5: memref<8x128xf32, #tpu.memory_space<vmem>>) attributes {dimension_semantics = [#tpu.dimension_semantics<parallel>], iteration_bounds = array<i64: 1>, scalar_prefetch = 0 : i64, scratch_operands = 0 : i64, tpu.core_type = #tpu.core_type<tc>, window_params = [{transform_indices = @transform_0, window_bounds = array<i64: 8, 128>}, {pipeline_mode = #tpu.pipeline_mode<synchronous>, transform_indices = @transform_1, window_bounds = array<i64: 1, 128>}, {pipeline_mode = #tpu.pipeline_mode<synchronous>, transform_indices = @transform_2, window_bounds = array<i64: 1, 128>}, {pipeline_mode = #tpu.pipeline_mode<synchronous>, transform_indices = @transform_3, window_bounds = array<i64: 1, 128>}, {transform_indices = @transform_4, window_bounds = array<i64: 8, 128>}]} {
    %c0 = arith.constant 0 : index
    %c0_0 = arith.constant 0 : index
    %0 = vector.load %arg1[%c0, %c0_0] : memref<8x128xf32, #tpu.memory_space<vmem>>, vector<8x128xf32>
    %c0_1 = arith.constant 0 : index
    %c0_2 = arith.constant 0 : index
    %1 = vector.load %arg2[%c0_1, %c0_2] : memref<1x128xf32, #tpu.memory_space<vmem>>, vector<1x128xf32>
    %c0_3 = arith.constant 0 : index
    %c0_4 = arith.constant 0 : index
    %2 = vector.load %arg3[%c0_3, %c0_4] : memref<1x128xf32, #tpu.memory_space<vmem>>, vector<1x128xf32>
    %c0_5 = arith.constant 0 : index
    %c0_6 = arith.constant 0 : index
    %3 = vector.load %arg4[%c0_5, %c0_6] : memref<1x128xf32, #tpu.memory_space<vmem>>, vector<1x128xf32>
    %cst = arith.constant 1.000000e+00 : f32
    %4 = vector.broadcast %cst : f32 to vector<1x128xf32>
    %5 = arith.subf %4, %1 : vector<1x128xf32>
    %6 = arith.mulf %2, %5 : vector<1x128xf32>
    %cst_7 = arith.constant 1.000000e+00 : f32
    %7 = vector.broadcast %cst_7 : f32 to vector<1x128xf32>
    %8 = arith.addf %7, %1 : vector<1x128xf32>
    %9 = arith.mulf %2, %8 : vector<1x128xf32>
    %cst_8 = arith.constant 1.000000e+00 : f32
    %10 = vector.broadcast %cst_8 : f32 to vector<1x128xf32>
    %11 = arith.subf %10, %1 : vector<1x128xf32>
    %cst_9 = arith.constant 9.99999997E-7 : f32
    %12 = vector.broadcast %cst_9 : f32 to vector<1x128xf32>
    %13 = arith.addf %11, %12 : vector<1x128xf32>
    %cst_10 = arith.constant 1.000000e+00 : f32
    %14 = vector.broadcast %cst_10 : f32 to vector<1x128xf32>
    %15 = arith.divf %14, %13 : vector<1x128xf32>
    %cst_11 = arith.constant 1.000000e+00 : f32
    %16 = vector.broadcast %cst_11 : f32 to vector<1x128xf32>
    %17 = arith.addf %16, %1 : vector<1x128xf32>
    %cst_12 = arith.constant 9.99999997E-7 : f32
    %18 = vector.broadcast %cst_12 : f32 to vector<1x128xf32>
    %19 = arith.addf %17, %18 : vector<1x128xf32>
    %cst_13 = arith.constant 1.000000e+00 : f32
    %20 = vector.broadcast %cst_13 : f32 to vector<1x128xf32>
    %21 = arith.divf %20, %19 : vector<1x128xf32>
    %22 = vector.broadcast %3 : vector<1x128xf32> to vector<8x128xf32>
    %23 = arith.mulf %0, %22 : vector<8x128xf32>
    %cst_14 = arith.constant 0.000000e+00 : f32
    %24 = vector.broadcast %cst_14 : f32 to vector<8x128xf32>
    %25 = arith.cmpf ole, %23, %24 : vector<8x128xf32>
    %26 = vector.shape_cast %6 : vector<1x128xf32> to vector<1x128xf32>
    %27 = vector.broadcast %26 : vector<1x128xf32> to vector<8x128xf32>
    %28 = vector.shape_cast %9 : vector<1x128xf32> to vector<1x128xf32>
    %29 = vector.broadcast %28 : vector<1x128xf32> to vector<8x128xf32>
    %30 = arith.select %25, %27, %29 : vector<8x128xi1>, vector<8x128xf32>
    %31 = vector.shape_cast %15 : vector<1x128xf32> to vector<1x128xf32>
    %32 = vector.broadcast %31 : vector<1x128xf32> to vector<8x128xf32>
    %33 = vector.shape_cast %21 : vector<1x128xf32> to vector<1x128xf32>
    %34 = vector.broadcast %33 : vector<1x128xf32> to vector<8x128xf32>
    %35 = arith.select %25, %32, %34 : vector<8x128xi1>, vector<8x128xf32>
    %36 = arith.mulf %23, %35 : vector<8x128xf32>
    %37 = math.tanh %36 : vector<8x128xf32>
    %38 = arith.mulf %30, %37 : vector<8x128xf32>
    %c0_15 = arith.constant 0 : index
    %c0_16 = arith.constant 0 : index
    %39 = vector.load %arg5[%c0_15, %c0_16] : memref<8x128xf32, #tpu.memory_space<vmem>>, vector<8x128xf32>
    tpu.vector_store %arg5[%c0_15, %c0_16], %38 {strides = array<i32>} : memref<8x128xf32, #tpu.memory_space<vmem>>, vector<8x128xf32>,
    return
  }
  func.func @transform_0(%arg0: i32) -> (i32, i32) {
    %c0_i32 = arith.constant 0 : i32
    %c0_i32_0 = arith.constant 0 : i32
    return %arg0, %c0_i32 : i32, i32
  }
  func.func @transform_1(%arg0: i32) -> (i32, i32) {
    %c0_i32 = arith.constant 0 : i32
    %c0_i32_0 = arith.constant 0 : i32
    %c0_i32_1 = arith.constant 0 : i32
    return %c0_i32, %c0_i32_0 : i32, i32
  }
  func.func @transform_2(%arg0: i32) -> (i32, i32) {
    %c0_i32 = arith.constant 0 : i32
    %c0_i32_0 = arith.constant 0 : i32
    %c0_i32_1 = arith.constant 0 : i32
    return %c0_i32, %c0_i32_0 : i32, i32
  }
  func.func @transform_3(%arg0: i32) -> (i32, i32) {
    %c0_i32 = arith.constant 0 : i32
    %c0_i32_0 = arith.constant 0 : i32
    %c0_i32_1 = arith.constant 0 : i32
    return %c0_i32, %c0_i32_0 : i32, i32
  }
  func.func @transform_4(%arg0: i32) -> (i32, i32) {
    %c0_i32 = arith.constant 0 : i32
    %c0_i32_0 = arith.constant 0 : i32
    return %arg0, %c0_i32 : i32, i32
  }
}

</mosaic_0001>

<bundles_post_ra>
// kernel: tpu_custom_call.1
= control target key start
LH: loop header
LB: loop body
LE: loop exit
PB: predicated region body
PF: predicated region fallthrough
CT: control target
= control target key end

     0   :  { %9 = vsyncpa [#allocation3], 0  ;;  %s192_s0 = inlined_call_operand.hbm [shape: f32[8,128], index: 0, kind: input, shape index: {}]   ;;  %s193_s1 = inlined_call_operand.vmem [shape: f32[1,128], index: 1, kind: input, shape index: {}]   ;;  %s194_s2 = inlined_call_operand.vmem [shape: f32[1,128], index: 2, kind: input, shape index: {}]   ;;  %s195_s3 = inlined_call_operand.vmem [shape: f32[1,128], index: 3, kind: input, shape index: {}]   ;;  %s196_s4 = inlined_call_operand.hbm [shape: f32[8,128], index: 4, kind: output, shape index: {}]  }
   0x1   :  { %10 = vsyncpa [#allocation4], 0  ;;  %s150_s15 = smov [#allocation2]  }
   0x2   :  { %s17_s16 = sshll.u32 %s150_s15, 4  ;;  %s18_s16 = int_to_ptr.vmem [resolvable:$true] %s17_s16 }
   0x3   :  { %s114_s17 = scalar_lea.vmem %s18_s16, 128  ;;  %p119_p1 = scmp.lt.s32.totalorder %s18_s16, %s18_s16 }
   0x4   :  { %p115_p0 = scmp.ne.s32.totalorder %s18_s16, %s114_s17  ;;  %p120_p2 = scmp.lt.s32.totalorder %s114_s17, %s114_s17 }
   0x6   :  { %p121_p3 = por %p120_p2, %p119_p1 }
   0x8   :  { %p122_p4 = pnand %p121_p3, %p115_p0 }
   0xa   :  { %125 = shalt.err (!%p122_p4)
}
   0xb   :  { %20 = dma.hbm_to_vmem [thread:$0]  %s192_s0, 128, %s18_s16, [#allocation3]  }
   0xc   :  { %146 = dma.done.wait [#allocation3], 128  }
   0xd   :  { %147 = vsyncadd [#allocation3], 4294967168  ;;  %v31_v0 = vld [vmem:[%s193_s1] sm:$0x1]  ;;  %v53_v5 = vlaneseq }
   0xe   :  { %v34_v1 = vsub.f32 1.0, %v31_v0  ;;  %v36_v2 = vadd.f32 1.0, %v31_v0  ;;  %v30_v7 = vld [vmem:[#allocation2] sm:$0xff] }
   0xf   :  { %v54_v6 = vshrl.u32 %v53_v5, 7  ;;  %v97_v8 = vld [vmem:[%s195_s3] ss:$0 sm:$0xff]  ;;  %s151_s3 = smov [#allocation5]  }
  0x10   :  { %v38_v3 = vadd.f32 1e-06, %v34_v1  ;;  %v41_v4 = vadd.f32 1e-06, %v36_v2  ;;  %v50_v9 = vmul.f32 %v97_v8, %v30_v7  ;;  %v32_v17 = vld [vmem:[%s194_s2] sm:$0x1] }
  0x11   :  { %v55_v10 = vsub.s32 0, %v54_v6  ;;  %v35_v18 = vmul.f32 %v34_v1, %v32_v17  ;;  %v37_v19 = vmul.f32 %v36_v2, %v32_v17  ;;  %s88_s24 = sshll.u32 %s151_s3, 4  ;;  %s89_s24 = int_to_ptr.vmem [resolvable:$true] %s88_s24 }
  0x12   :  { %100 = vrcp.f32 %v38_v3  ;;  %vm51_vm0 = vcmp.le.f32.partialorder %v50_v9, 0.0  ;;  %s126_s25 = scalar_lea.vmem %s89_s24, 128  ;;  %p131_p6 = scmp.lt.s32.totalorder %s89_s24, %s89_s24 }
  0x13   :  { %102 = vrcp.f32 %v41_v4  ;;  %v56_v20 = vrot.slane %v35_v18, %v55_v10  ;;  %v62_v21 = vrot.slane %v37_v19, %v55_v10  ;;  %p127_p5 = scmp.ne.s32.totalorder %s89_s24, %s126_s25  ;;  %p132_p7 = scmp.lt.s32.totalorder %s126_s25, %s126_s25 }
  0x15   :  { %v64_v22 = vsel %vm51_vm0, %v56_v20, %v62_v21  ;;  %p133_p8 = por %p132_p7, %p131_p6 }
  0x17   :  { %p134_p9 = pnand %p133_p8, %p127_p5 }
  0x1f   :  { %v101_v11 = vpop.eup %100 }
  0x20   :  { %v103_v12 = vpop.eup %102  ;;  %v69_v13 = vrot.slane %v101_v11, %v55_v10 }
  0x21   :  { %v75_v14 = vrot.slane %v103_v12, %v55_v10 }
  0x23   :  { %v77_v15 = vsel %vm51_vm0, %v69_v13, %v75_v14 }
  0x24   :  { %v78_v16 = vmul.f32 %v77_v15, %v50_v9 }
  0x26   :  { %104 = vtanh.f32 %v78_v16 }
  0x33   :  { %v105_v23 = vpop.eup %104 }
  0x34   :  { %v80_v24 = vmul.f32 %v105_v23, %v64_v22 }
  0x36   :  { %81 = vst [vmem:[#allocation5] sm:$0xff] %v80_v24 }
  0x37   :  { %137 = shalt.err (!%p134_p9)
}
  0x38   :  { %91 = dma.vmem_to_hbm [thread:$0]  %s89_s24, 128, %s196_s4, [#allocation4]  }
  0x39   :  { %148 = dma.done.wait [#allocation4], 128  }
  0x3a   :  { %149 = vsyncadd [#allocation4], 4294967168 }
  0x3b   :  { %95 = vsyncpa [#allocation3], 1 }
  0x3c   :  { %96 = vsyncpa [#allocation4], 1 }

</bundles_post_ra>
